<compile_context>
chip_gen: v7x
topology: tpu7x:2x2x1
jax: 0.10.0
libtpu: 0.0.40
codegen_flags: <defaults>
</compile_context>

<pallas_src>
import math

import jax
import jax.numpy as jnp
from jax.experimental import pallas as pl
from jax.experimental.pallas import tpu as pltpu


def _make_mlp_kernel(n_layers: int, n_inputs: int, n_ctx: int):
    """Kernel: fused (concat + L linear layers with ReLU between hidden layers).

    Ref layout (per grid step = one task):
      x_ref    : (B, n_inputs)
      ctx_ref  : (1, n_ctx)            -- only present if n_ctx > 0
      w_i      : (in_i, out_i)         -- shared across tasks (resident)
      b_i      : (1, out_i)
      out_ref  : (B, n_outputs)
    """

    def kernel(*refs):
        idx = 0
        x_ref = refs[idx]
        idx += 1
        if n_ctx > 0:
            ctx_ref = refs[idx]
            idx += 1
        out_ref = refs[-1]
        param_refs = refs[idx:-1]  # (w0, b0, w1, b1, ...)

        x = x_ref[...].astype(jnp.float32)          # (B, n_inputs)
        w0 = param_refs[0][...].astype(jnp.float32)  # (n_inputs + n_ctx, h0)
        b0 = param_refs[1][...].astype(jnp.float32)  # (1, h0)

        # First layer with the task-context concat fused in:
        #   concat([x, ctx]) @ W0 == x @ W0[:n_in] + ctx @ W0[n_in:]
        h = jnp.dot(x, w0[:n_inputs, :], preferred_element_type=jnp.float32)
        if n_ctx > 0:
            ctx = ctx_ref[...].astype(jnp.float32)   # (1, n_ctx)
            h = h + jnp.dot(ctx, w0[n_inputs:, :],
                            preferred_element_type=jnp.float32)  # broadcasts (1,h0)
        h = h + b0
        if n_layers > 1:
            h = jnp.maximum(h, 0.0)  # ReLU on hidden layers only

        # Remaining layers.
        for i in range(1, n_layers):
            w = param_refs[2 * i][...].astype(jnp.float32)
            b = param_refs[2 * i + 1][...].astype(jnp.float32)
            h = jnp.dot(h, w, preferred_element_type=jnp.float32) + b
            if i < n_layers - 1:
                h = jnp.maximum(h, 0.0)

        out_ref[...] = h.astype(out_ref.dtype)

    return kernel


def maml_forward_batched(xs, task_contexts, weights, biases):
    """Task-batched Pallas forward.

    xs:             (T, B, n_inputs) float32
    task_contexts:  (T, n_ctx)       float32  (per-task adapted contexts)
    weights[i]:     (in_i, out_i)    float32  (shared across tasks)
    biases[i]:      (out_i,)         float32
    returns:        (T, B, n_outputs)
    """
    T, B, n_in = xs.shape
    n_ctx = task_contexts.shape[1]
    n_layers = len(weights)
    n_out = weights[-1].shape[1]

    in_specs = [pl.BlockSpec((None, B, n_in), lambda t: (t, 0, 0))]
    operands = [xs]
    if n_ctx > 0:
        ctx3 = task_contexts.reshape(T, 1, n_ctx)
        in_specs.append(pl.BlockSpec((None, 1, n_ctx), lambda t: (t, 0, 0)))
        operands.append(ctx3)

    # Weights/biases: constant index maps -> fetched once, stay resident in VMEM.
    for w, b in zip(weights, biases):
        in_specs.append(pl.BlockSpec(w.shape, lambda t: (0, 0)))
        operands.append(w)
        in_specs.append(pl.BlockSpec((1, b.shape[0]), lambda t: (0, 0)))
        operands.append(b.reshape(1, -1))

    out_spec = pl.BlockSpec((None, B, n_out), lambda t: (t, 0, 0))

    return pl.pallas_call(
        _make_mlp_kernel(n_layers, n_in, n_ctx),
        out_shape=jax.ShapeDtypeStruct((T, B, n_out), xs.dtype),
        grid=(T,),
        in_specs=in_specs,
        out_specs=out_spec,
        compiler_params=pltpu.CompilerParams(
            dimension_semantics=("parallel",)  # shard tasks across TCs on v7x
        ),
    )(*operands)


def maml_forward(x, task_context, weights, biases):
    """Single-task convenience wrapper (T=1 grid)."""
    y = maml_forward_batched(x[None], task_context[None], weights, biases)
    return y[0]


def init_params(key, n_inputs, n_outputs, n_weights, num_context_params):
    """Deterministic re-implementation of MamlModel.__init__/_reset_parameters."""
    nodes_per_layer = list(n_weights) + [n_outputs]
    task_context = jnp.zeros((num_context_params,), dtype=jnp.float32)
    weights, biases = [], []
    prev = n_inputs + num_context_params
    for n in nodes_per_layer:
        stdv = 1.0 / math.sqrt(n)
        key, kw, kb = jax.random.split(key, 3)
        w = jax.random.uniform(kw, (prev, n), jnp.float32, minval=-stdv, maxval=stdv)
        b = jax.random.uniform(kb, (n,), jnp.float32, minval=-stdv, maxval=stdv)
        weights.append(w)
        biases.append(b)
        prev = n
    return task_context, weights, biases


def reference_forward(x, task_context, weights, biases):
    """Pure-JAX reference (mirrors the PyTorch forward exactly)."""
    B = x.shape[0]
    if task_context.shape[0] != 0:
        x = jnp.concatenate(
            [x, jnp.broadcast_to(task_context[None, :], (B, task_context.shape[0]))],
            axis=1,
        )
    for i in range(len(weights) - 1):
        x = jax.nn.relu(x @ weights[i] + biases[i])
    return x @ weights[-1] + biases[-1]


if __name__ == "__main__":
    # Small, MAML-regression-like shapes.
    n_inputs = 4
    n_outputs = 2
    n_weights = [32, 32]          # hidden layer widths
    num_context_params = 4
    batch = 8                     # multiple of 8 -> full f32 sublanes
    num_tasks = 4                 # batched into a single pallas_call

    key = jax.random.PRNGKey(0)
    key, kx, kc = jax.random.split(key, 3)
    _, weights, biases = init_params(
        key, n_inputs, n_outputs, n_weights, num_context_params
    )
    xs = jax.random.normal(kx, (num_tasks, batch, n_inputs), dtype=jnp.float32)
    # Per-task (adapted) contexts, as produced by the MAML inner loop.
    ctxs = 0.1 * jax.random.normal(
        kc, (num_tasks, num_context_params), dtype=jnp.float32
    )

    # Task-batched forward: one pallas_call for all tasks.
    ys = maml_forward_batched(xs, ctxs, weights, biases)
    ys = jax.block_until_ready(ys)

    ys_ref = jnp.stack(
        [reference_forward(xs[t], ctxs[t], weights, biases) for t in range(num_tasks)]
    )
    assert ys.shape == (num_tasks, batch, n_outputs)
    assert jnp.allclose(ys, ys_ref, atol=1e-5, rtol=1e-5)

    # Single-task path (module-equivalent call signature).
    y1 = maml_forward(xs[0], ctxs[0], weights, biases)
    y1 = jax.block_until_ready(y1)
    assert jnp.allclose(y1, ys_ref[0], atol=1e-5, rtol=1e-5)

    print("KERNEL_OK")
</pallas_src>

<mosaic_0001>
module attributes {stable_mosaic.version = 11 : i64} {
  func.func @kernel(%arg0: i32, %arg1: memref<1x8x4xf32, #tpu.memory_space<vmem>>, %arg2: memref<1x1x4xf32, #tpu.memory_space<vmem>>, %arg3: memref<8x32xf32, #tpu.memory_space<vmem>>, %arg4: memref<1x32xf32, #tpu.memory_space<vmem>>, %arg5: memref<32x32xf32, #tpu.memory_space<vmem>>, %arg6: memref<1x32xf32, #tpu.memory_space<vmem>>, %arg7: memref<32x2xf32, #tpu.memory_space<vmem>>, %arg8: memref<1x2xf32, #tpu.memory_space<vmem>>, %arg9: memref<1x8x2xf32, #tpu.memory_space<vmem>>) attributes {dimension_semantics = [#tpu.dimension_semantics<parallel>], iteration_bounds = array<i64: 4>, scalar_prefetch = 0 : i64, scratch_operands = 0 : i64, tpu.core_type = #tpu.core_type<tc>, window_params = [{transform_indices = @transform_0, window_bounds = array<i64: 1, 8, 4>}, {transform_indices = @transform_1, window_bounds = array<i64: 1, 1, 4>}, {pipeline_mode = #tpu.pipeline_mode<synchronous>, transform_indices = @transform_2, window_bounds = array<i64: 8, 32>}, {pipeline_mode = #tpu.pipeline_mode<synchronous>, transform_indices = @transform_3, window_bounds = array<i64: 1, 32>}, {pipeline_mode = #tpu.pipeline_mode<synchronous>, transform_indices = @transform_4, window_bounds = array<i64: 32, 32>}, {pipeline_mode = #tpu.pipeline_mode<synchronous>, transform_indices = @transform_5, window_bounds = array<i64: 1, 32>}, {pipeline_mode = #tpu.pipeline_mode<synchronous>, transform_indices = @transform_6, window_bounds = array<i64: 32, 2>}, {pipeline_mode = #tpu.pipeline_mode<synchronous>, transform_indices = @transform_7, window_bounds = array<i64: 1, 2>}, {transform_indices = @transform_8, window_bounds = array<i64: 1, 8, 2>}]} {
    %c0 = arith.constant 0 : index
    %c0_0 = arith.constant 0 : index
    %c0_1 = arith.constant 0 : index
    %0 = vector.load %arg1[%c0, %c0_0, %c0_1] : memref<1x8x4xf32, #tpu.memory_space<vmem>>, vector<1x8x4xf32>
    %1 = vector.shape_cast %0 : vector<1x8x4xf32> to vector<8x4xf32>
    %c0_2 = arith.constant 0 : index
    %c0_3 = arith.constant 0 : index
    %2 = vector.load %arg3[%c0_2, %c0_3] : memref<8x32xf32, #tpu.memory_space<vmem>>, vector<8x32xf32>
    %c0_4 = arith.constant 0 : index
    %c0_5 = arith.constant 0 : index
    %3 = vector.load %arg4[%c0_4, %c0_5] : memref<1x32xf32, #tpu.memory_space<vmem>>, vector<1x32xf32>
    %4 = vector.extract_strided_slice %2 {offsets = [0, 0], sizes = [4, 32], strides = [1, 1]} : vector<8x32xf32> to vector<4x32xf32>
    %cst = arith.constant dense<0.000000e+00> : vector<8x32xf32>
    %5 = tpu.matmul %1, %4, %cst {dimension_numbers = #tpu.dot_dimension_numbers<[1], [0], [0], [1], [0, 0, 1, 1], [], []>} : vector<8x4xf32>, vector<4x32xf32>, vector<8x32xf32> -> vector<8x32xf32>
    %c0_6 = arith.constant 0 : index
    %c0_7 = arith.constant 0 : index
    %c0_8 = arith.constant 0 : index
    %6 = vector.load %arg2[%c0_6, %c0_7, %c0_8] : memref<1x1x4xf32, #tpu.memory_space<vmem>>, vector<1x1x4xf32>
    %7 = vector.shape_cast %6 : vector<1x1x4xf32> to vector<1x4xf32>
    %8 = vector.extract_strided_slice %2 {offsets = [4, 0], sizes = [4, 32], strides = [1, 1]} : vector<8x32xf32> to vector<4x32xf32>
    %cst_9 = arith.constant dense<0.000000e+00> : vector<1x32xf32>
    %9 = tpu.matmul %7, %8, %cst_9 {dimension_numbers = #tpu.dot_dimension_numbers<[1], [0], [0], [1], [0, 0, 1, 1], [], []>} : vector<1x4xf32>, vector<4x32xf32>, vector<1x32xf32> -> vector<1x32xf32>
    %10 = vector.broadcast %9 : vector<1x32xf32> to vector<8x32xf32>
    %11 = arith.addf %5, %10 : vector<8x32xf32>
    %12 = vector.broadcast %3 : vector<1x32xf32> to vector<8x32xf32>
    %13 = arith.addf %11, %12 : vector<8x32xf32>
    %cst_10 = arith.constant 0.000000e+00 : f32
    %14 = vector.broadcast %cst_10 : f32 to vector<8x32xf32>
    %15 = arith.maximumf %13, %14 : vector<8x32xf32>
    %c0_11 = arith.constant 0 : index
    %c0_12 = arith.constant 0 : index
    %16 = vector.load %arg5[%c0_11, %c0_12] : memref<32x32xf32, #tpu.memory_space<vmem>>, vector<32x32xf32>
    %c0_13 = arith.constant 0 : index
    %c0_14 = arith.constant 0 : index
    %17 = vector.load %arg6[%c0_13, %c0_14] : memref<1x32xf32, #tpu.memory_space<vmem>>, vector<1x32xf32>
    %cst_15 = arith.constant dense<0.000000e+00> : vector<8x32xf32>
    %18 = tpu.matmul %15, %16, %cst_15 {dimension_numbers = #tpu.dot_dimension_numbers<[1], [0], [0], [1], [0, 0, 1, 1], [], []>} : vector<8x32xf32>, vector<32x32xf32>, vector<8x32xf32> -> vector<8x32xf32>
    %19 = vector.broadcast %17 : vector<1x32xf32> to vector<8x32xf32>
    %20 = arith.addf %18, %19 : vector<8x32xf32>
    %cst_16 = arith.constant 0.000000e+00 : f32
    %21 = vector.broadcast %cst_16 : f32 to vector<8x32xf32>
    %22 = arith.maximumf %20, %21 : vector<8x32xf32>
    %c0_17 = arith.constant 0 : index
    %c0_18 = arith.constant 0 : index
    %23 = vector.load %arg7[%c0_17, %c0_18] : memref<32x2xf32, #tpu.memory_space<vmem>>, vector<32x2xf32>
    %c0_19 = arith.constant 0 : index
    %c0_20 = arith.constant 0 : index
    %24 = vector.load %arg8[%c0_19, %c0_20] : memref<1x2xf32, #tpu.memory_space<vmem>>, vector<1x2xf32>
    %cst_21 = arith.constant dense<0.000000e+00> : vector<8x2xf32>
    %25 = tpu.matmul %22, %23, %cst_21 {dimension_numbers = #tpu.dot_dimension_numbers<[1], [0], [0], [1], [0, 0, 1, 1], [], []>} : vector<8x32xf32>, vector<32x2xf32>, vector<8x2xf32> -> vector<8x2xf32>
    %26 = vector.broadcast %24 : vector<1x2xf32> to vector<8x2xf32>
    %27 = arith.addf %25, %26 : vector<8x2xf32>
    %c0_22 = arith.constant 0 : index
    %c0_23 = arith.constant 0 : index
    %c0_24 = arith.constant 0 : index
    %28 = vector.load %arg9[%c0_22, %c0_23, %c0_24] : memref<1x8x2xf32, #tpu.memory_space<vmem>>, vector<1x8x2xf32>
    %29 = vector.shape_cast %28 : vector<1x8x2xf32> to vector<8x2xf32>
    %30 = vector.shape_cast %27 : vector<8x2xf32> to vector<1x8x2xf32>
    tpu.vector_store %arg9[%c0_22, %c0_23, %c0_24], %30 {strides = array<i32>} : memref<1x8x2xf32, #tpu.memory_space<vmem>>, vector<1x8x2xf32>,
    return
  }
  func.func @transform_0(%arg0: i32) -> (i32, i32, i32) {
    %c0_i32 = arith.constant 0 : i32
    %c0_i32_0 = arith.constant 0 : i32
    %c0_i32_1 = arith.constant 0 : i32
    return %arg0, %c0_i32, %c0_i32_0 : i32, i32, i32
  }
  func.func @transform_1(%arg0: i32) -> (i32, i32, i32) {
    %c0_i32 = arith.constant 0 : i32
    %c0_i32_0 = arith.constant 0 : i32
    %c0_i32_1 = arith.constant 0 : i32
    return %arg0, %c0_i32, %c0_i32_0 : i32, i32, i32
  }
  func.func @transform_2(%arg0: i32) -> (i32, i32) {
    %c0_i32 = arith.constant 0 : i32
    %c0_i32_0 = arith.constant 0 : i32
    %c0_i32_1 = arith.constant 0 : i32
    return %c0_i32, %c0_i32_0 : i32, i32
  }
  func.func @transform_3(%arg0: i32) -> (i32, i32) {
    %c0_i32 = arith.constant 0 : i32
    %c0_i32_0 = arith.constant 0 : i32
    %c0_i32_1 = arith.constant 0 : i32
    return %c0_i32, %c0_i32_0 : i32, i32
  }
  func.func @transform_4(%arg0: i32) -> (i32, i32) {
    %c0_i32 = arith.constant 0 : i32
    %c0_i32_0 = arith.constant 0 : i32
    %c0_i32_1 = arith.constant 0 : i32
    return %c0_i32, %c0_i32_0 : i32, i32
  }
  func.func @transform_5(%arg0: i32) -> (i32, i32) {
    %c0_i32 = arith.constant 0 : i32
    %c0_i32_0 = arith.constant 0 : i32
    %c0_i32_1 = arith.constant 0 : i32
    return %c0_i32, %c0_i32_0 : i32, i32
  }
  func.func @transform_6(%arg0: i32) -> (i32, i32) {
    %c0_i32 = arith.constant 0 : i32
    %c0_i32_0 = arith.constant 0 : i32
    %c0_i32_1 = arith.constant 0 : i32
    return %c0_i32, %c0_i32_0 : i32, i32
  }
  func.func @transform_7(%arg0: i32) -> (i32, i32) {
    %c0_i32 = arith.constant 0 : i32
    %c0_i32_0 = arith.constant 0 : i32
    %c0_i32_1 = arith.constant 0 : i32
    return %c0_i32, %c0_i32_0 : i32, i32
  }
  func.func @transform_8(%arg0: i32) -> (i32, i32, i32) {
    %c0_i32 = arith.constant 0 : i32
    %c0_i32_0 = arith.constant 0 : i32
    %c0_i32_1 = arith.constant 0 : i32
    return %arg0, %c0_i32, %c0_i32_0 : i32, i32, i32
  }
}

</mosaic_0001>

<bundles_post_ra>
// kernel: tpu_custom_call.1
= control target key start
LH: loop header
LB: loop body
LE: loop exit
PB: predicated region body
PF: predicated region fallthrough
CT: control target
= control target key end

     0   :  { %s862_s27 = smov 0   ;;  %s930_s0 = inlined_call_operand.vmem [shape: f32[4,8,4], index: 0, kind: input, shape index: {}]   ;;  %s931_s1 = inlined_call_operand.vmem [shape: f32[4,1,4], index: 1, kind: input, shape index: {}]   ;;  %s932_s2 = inlined_call_operand.vmem [shape: f32[8,32], index: 2, kind: input, shape index: {}]   ;;  %s933_s3 = inlined_call_operand.vmem [shape: f32[1,32], index: 3, kind: input, shape index: {}]   ;;  %s934_s4 = inlined_call_operand.vmem [shape: f32[32,32], index: 4, kind: input, shape index: {}]   ;;  %s935_s5 = inlined_call_operand.vmem [shape: f32[1,32], index: 5, kind: input, shape index: {}]   ;;  %s936_s6 = inlined_call_operand.vmem [shape: f32[32,2], index: 6, kind: input, shape index: {}]   ;;  %s937_s7 = inlined_call_operand.vmem [shape: f32[1,2], index: 7, kind: input, shape index: {}]   ;;  %s938_s8 = inlined_call_operand.vmem [shape: f32[4,8,2], index: 8, kind: output, shape index: {}]  }
   0x1 LB: > { %s719_s28 = sadd.s32 4294967295, %s812_s27   ;;  %p723_p0 = scmp.ge.s32.totalorder %s812_s27, 1  ;;  %s812_s27 = sphi %s862_s27, %s18_s27  }
   0x2   : > { %p269_p1 = scmp.lt.s32.totalorder %s812_s27, 5 }
   0x4   : > { %p270_p2 = pnand %p723_p0, %p269_p1 }
   0x5   : > { %v316_v0 = vld [vmem:[%s932_s2] sm:$0xff] (!%p270_p2)  ;;  %vm325_vm0 = vcmask (!%p270_p2), 1043456   ;;  %p304_p3 = scmp.lt.s32.totalorder (!%p270_p2), %s719_s28, 3  ;;  %v814_v1 = vmov (!%p270_p2), 0.0   ;;  %vm815_vm1 = vmmov (!%p270_p2), 0   ;;  %vm321_vm2 = vcmask (!%p270_p2), 31744  }
   0x6   : > { %273 = sbr.rel (%p270_p2) target bundleno = 667 (0x29b), region = 52  ;;  %751 = vmatprep.subr.mxu0 (!%p270_p2), %v814_v1  ;;  %v320_v2 = vrot.slane (!%p270_p2), %v316_v0, 4  ;;  %753 = vmatprep.mubr.msk.f32.mxu0 (!%p270_p2), %vm815_vm1, %v814_v1  ;;  %v485_v5 = vld [vmem:[%s934_s4] sm:$0xff] (!%p270_p2)  ;;  %v486_v6 = vld [vmem:[%s934_s4 + $0x8] sm:$0xff] (!%p270_p2)  ;;  %v816_v8 = vmov (!%p270_p2), 0.0|0.0   ;;  %v487_v9 = vld [vmem:[%s934_s4 + $0x10] sm:$0xff] (!%p270_p2)  ;;  %v398_v15 = vlaneseq (!%p270_p2) }
   0x7   : > { %756 = vmatprep.subr.mxu1 (!%p270_p2), %v814_v1  ;;  %758 = vmatprep.mubr.msk.f32.mxu1 (!%p270_p2), %vm815_vm1, %v814_v1  ;;  %v784_v7 = vpack.c.bf16 (!%p270_p2), %v486_v6, %v485_v5  ;;  %v488_v10 = vld [vmem:[%s934_s4 + $0x18] sm:$0xff] (!%p270_p2)  ;;  %v571_v12 = vld [vmem:[%s936_s6] sm:$0xff] (!%p270_p2)  ;;  %v572_v13 = vld [vmem:[%s936_s6 + $0x8] sm:$0xff] (!%p270_p2)  ;;  %vm496_vm3 = vcmask (!%p270_p2), 261120   ;;  %vm655_vm4 = vcmask (!%p270_p2), 15360  }
   0x8   : > { %752 = vmatpush3.msk.msra.mxu0 (!%p270_p2), %vm325_vm0, %v320_v2  ;;  %757 = vmatpush3.msk.msra.mxu1 (!%p270_p2), %vm325_vm0, %v316_v0  ;;  %v787_v11 = vpack.c.bf16 (!%p270_p2), %v488_v10, %v487_v9  ;;  %v790_v14 = vpack.c.bf16 (!%p270_p2), %v572_v13, %v571_v12  ;;  %v399_v16 = vshrl.u32 (!%p270_p2), %v398_v15, 7  ;;  %v730_v22 = vld [vmem:[%s933_s3] ss:$0 sm:$0xff] (!%p270_p2)  ;;  %v573_v27 = vld [vmem:[%s936_s6 + $0x10] sm:$0xff] (!%p270_p2)  ;;  %v574_v28 = vld [vmem:[%s936_s6 + $0x18] sm:$0xff] (!%p270_p2) }
   0x9   : > { %783 = vmatprep.subr.bf16.mxu0 (!%p270_p2), %v816_v8  ;;  %789 = vmatprep.subr.bf16.mxu1 (!%p270_p2), %v816_v8  ;;  %v793_v29 = vpack.c.bf16 (!%p270_p2), %v574_v28, %v573_v27  ;;  %v731_v30 = vld [vmem:[%s935_s5] ss:$0 sm:$0xff] (!%p270_p2) }
   0xa   : > { %v400_v17 = vsub.s32 (!%p270_p2), 0, %v399_v16  ;;  %v733_v35 = vld [vmem:[%s937_s7] ss:$0 sm:$0xff] (!%p270_p2) }
   0xd   : > { %s940_s28 = smov (!%p304_p3, %s719_s28), 3 }
   0xe   : > { %s310_s11 = scalar_lea.vmem %s931_s1, %s940_s28  ;;  %s724_s12 = sshll.u32 %s940_s28, 3 }
   0xf   : > { %v318_v3 = vld [vmem:[%s310_s11] sm:$0x1]  ;;  %s307_s15 = scalar_lea.vmem %s930_s0, %s724_s12  ;;  %s314_s21 = scalar_lea.vmem %s938_s8, %s724_s12 }
  0x10   : > { %754 = vmatmul.mubr.msk.f32.vlgmr.msra.gmra.mrb[0].mxu0 %vm321_vm2, %v318_v3  ;;  %v315_v4 = vld [vmem:[%s307_s15] sm:$0xff] }
  0x11   : > { %759 = vmatmul.mubr.msk.f32.vlgmr.msra.gmra.mrb[0].mxu1 %vm321_vm2, %v315_v4  ;;  %769 = vmatprep.mubr.msk.f32.mxu0 %vm815_vm1, %v814_v1 }
  0x12   : > { %780 = vmatprep.mubr.msk.f32.mxu1 %vm815_vm1, %v814_v1  ;;  %785 = vmatpush3.bf16.msra.mxu0 %v784_v7 }
  0x13   : > { %786 = vmatprep.subr.bf16.mxu0 %v816_v8  ;;  %791 = vmatpush3.bf16.msra.mxu1 %v790_v14 }
  0x14   : > { %792 = vmatprep.subr.bf16.mxu1 %v816_v8 }
  0x16   : > { %788 = vmatpush3.bf16.msra.mxu0 %v787_v11 }
  0x17   : > { %794 = vmatpush3.bf16.msra.mxu1 %v793_v29 }
  0xe3   : > { %v394_v18 = vpop.f32.mrb[0].mxu0 }
  0xe4   : > { %v401_v19 = vrot.slane %v394_v18, %v400_v17  ;;  %v755_v20 = vpop.f32.mrb[1].mxu0  ;;  %v473_v21 = vpop.f32.mrb[0].mxu1 }
  0xe5   : > { %v760_v23 = vpop.f32.mrb[1].mxu1 }
  0xe6   : > { %v474_v24 = vadd.f32 %v473_v21, %v401_v19 }
  0xe8   : > { %v483_v25 = vadd.f32 %v730_v22, %v474_v24 }
  0xea   : > { %v484_v26 = vmax.f32 %v483_v25, 0.0 }
  0xec   : > { %770 = vmatmul.mubr.msk.f32.vlgmr.msra.gmra.mrb[2].mxu0 %vm496_vm3, %v484_v26 }
 0x1bf   : > { %v566_v31 = vpop.f32.mrb[2].mxu0 }
 0x1c0   : > { %v567_v32 = vadd.f32 %v731_v30, %v566_v31  ;;  %v771_v33 = vpop.f32.mrb[3].mxu0 }
 0x1c2   : > { %v570_v34 = vmax.f32 %v567_v32, 0.0 }
 0x1c4   : > { %781 = vmatmul.mubr.msk.f32.vlgmr.msra.gmra.mrb[2].mxu1 %vm496_vm3, %v570_v34 }
 0x297   : > { %v651_v36 = vpop.f32.mrb[2].mxu1 }
 0x298   : > { %v652_v37 = vadd.f32 %v733_v35, %v651_v36  ;;  %v782_v38 = vpop.f32.mrb[3].mxu1 }
 0x29a   : > { %656 = vst.msk [vmem:[%s314_s21] sm:$0xff] %vm655_vm4, %v652_v37 }
 0x29b PF: > { %s18_s27 = sadd.s32 1, %s812_s27  }
 0x29c   : > { %p15_p4 = scmp.ge.s32.totalorder %s18_s27, 6  }
 0x29e   :  { %17 = sbr.rel (!%p15_p4) target bundleno = 1 (0x1), region = 85 }

</bundles_post_ra>
